<compile_context>
chip_gen: v7x
topology: tpu7x:2x2x1
jax: 0.10.0
libtpu: 0.0.40
codegen_flags: <defaults>
</compile_context>

<pallas_src>
import functools

import jax
import jax.numpy as jnp
from jax import lax
from jax.experimental import pallas as pl
from jax.experimental.pallas import tpu as pltpu


def _patch_kernel(x_ref, o_ref, *, C, Ws, size, k):
    """One grid step = one (batch, row-band) pair.

    x_ref : (1, C, Hp, Wp)        pre-padded image; its index_map ignores the band
                                  axis, so it is DMA'd once per batch and reused.
    o_ref : (1, 1, Ws, C, k, k)   all Ws patches of this band, already laid out in
                                  the final (P, C, k, k) memory order.
    """
    i = pl.program_id(1)                              # band index within the image
    row0 = pl.multiple_of(i * size, size)
    band = x_ref[0, :, pl.ds(row0, k), :]             # (C, k, Wp)

    if Ws <= 16:
        # Small band: unrolled static lane slices, one stacked store.
        pieces = [band[:, :, j * size:j * size + k] for j in range(Ws)]
        o_ref[0, 0] = jnp.stack(pieces, axis=0)       # (Ws, C, k, k)
    else:
        # Large band: keep the per-iteration register footprint constant instead of
        # fully unrolling Ws window slices (avoids vreg spills for Ws >> k).
        @pl.loop(0, Ws)
        def _(j):
            piece = lax.dynamic_slice(band, (0, 0, j * size), (C, k, k))
            o_ref[0, 0, pl.ds(j, 1)] = piece[None]


def _ceil_to(a, m):
    return (a + m - 1) // m * m


def _padded_block_bytes(shape, dtype):
    """Bytes of a VMEM block with last two dims padded to the dtype's native tile."""
    itemsize = jnp.dtype(dtype).itemsize
    sublane = max(8, 32 // itemsize)       # 8 (f32) / 16 (bf16) / 32 (int8, fp8)
    lead = 1
    for d in shape[:-2]:
        lead *= d
    return lead * _ceil_to(shape[-2], sublane) * _ceil_to(shape[-1], 128) * itemsize


def _vmem_capacity_bytes():
    """Physical VMEM of the attached chip; conservative (v7x) fallback if unknown."""
    try:
        cap = getattr(pltpu.get_tpu_info(), "vmem_capacity_bytes", None)
        if cap:
            return int(cap)
    except Exception:
        pass
    return 64 << 20


@functools.partial(jax.jit, static_argnames=("padding", "size"))
def generate_mask_all_patches(out_lr, padding=1, size=4):
    """JAX/Pallas equivalent of the PyTorch module's forward()."""
    B, C, H, W = out_lr.shape
    assert H % size == 0 and W % size == 0, "H and W must be multiples of `size`"
    Hs, Ws = H // size, W // size
    k = size + 2 * padding
    Hp, Wp = H + 2 * padding, W + 2 * padding
    P = B * Hs * Ws
    dt = out_lr.dtype

    # F.pad done once here; the kernel then only issues aligned reads of padded data.
    xp = jnp.pad(out_lr, ((0, 0), (0, 0), (padding, padding), (padding, padding)))

    kernel = functools.partial(_patch_kernel, C=C, Ws=Ws, size=size, k=k)

    in_block = (1, C, Hp, Wp)
    out_block = (1, 1, Ws, C, k, k)
    need = (2 * _padded_block_bytes(in_block, dt)      # double-buffered input
            + 2 * _padded_block_bytes(out_block, dt)   # double-buffered output
            + (4 << 20))                               # compiler slack
    cap = max(32 << 20, _vmem_capacity_bytes() - (4 << 20))
    vmem_limit = int(min(max(need, 32 << 20), cap))
    # TODO(synk): if `need` exceeds `cap` (e.g. C=64, H=W>=512 f32 on v7x's 64 MiB
    # VMEM), switch the input to memory_space=pl.ANY with manual double-buffered
    # make_async_copy of (C, k, Wp) halo bands so only a few MiB live in VMEM.

    slab = pl.pallas_call(
        kernel,
        out_shape=jax.ShapeDtypeStruct((B, Hs, Ws, C, k, k), dt),
        grid_spec=pltpu.PrefetchScalarGridSpec(
            num_scalar_prefetch=0,
            grid=(B, Hs),
            in_specs=[pl.BlockSpec(in_block, lambda b, i: (b, 0, 0, 0))],
            out_specs=pl.BlockSpec(out_block, lambda b, i: (b, i, 0, 0, 0, 0)),
        ),
        compiler_params=pltpu.CompilerParams(
            dimension_semantics=("parallel", "parallel"),
            vmem_limit_bytes=vmem_limit),
    )(xp)

    # (B, Hs, Ws, C, k, k) is already the row-major (P, C, k, k) memory order:
    # this is a free reshape, no transpose / extra HBM pass.
    patches = slab.reshape(P, C, k, k)

    # idx = torch.nonzero(ones(B, Hs, Ws)) -> all (b, i, j) triples, row-major.
    # (PyTorch returns int64; int32 is sufficient here -- cast downstream if needed.)
    bb, ii, jj = jnp.meshgrid(
        jnp.arange(B, dtype=jnp.int32),
        jnp.arange(Hs, dtype=jnp.int32),
        jnp.arange(Ws, dtype=jnp.int32),
        indexing="ij")
    idx = (bb.reshape(-1), ii.reshape(-1), jj.reshape(-1))
    return patches, idx


def _reference(out_lr, padding=1, size=4):
    """Pure-JAX reference of the PyTorch semantics (validation only)."""
    B, C, H, W = out_lr.shape
    Hs, Ws = H // size, W // size
    k = size + 2 * padding
    xp = jnp.pad(out_lr, ((0, 0), (0, 0), (padding, padding), (padding, padding)))
    pats = []
    for b in range(B):
        for i in range(Hs):
            for j in range(Ws):
                pats.append(xp[b, :, i * size:i * size + k, j * size:j * size + k])
    return jnp.stack(pats, axis=0)


if __name__ == "__main__":
    key = jax.random.PRNGKey(0)
    B, C, H, W = 2, 4, 16, 16
    x = jax.random.normal(key, (B, C, H, W), dtype=jnp.float32)

    patches, idx = generate_mask_all_patches(x, padding=1, size=4)
    patches = jax.block_until_ready(patches)
    idx = jax.tree_util.tree_map(jax.block_until_ready, idx)

    # sanity check against the pure-JAX reference
    ref = _reference(x, padding=1, size=4)
    assert patches.shape == (B * (H // 4) * (W // 4), C, 6, 6), patches.shape
    assert jnp.allclose(patches, ref), "patch mismatch vs reference"
    assert idx[0].shape == (B * (H // 4) * (W // 4),)
    assert int(idx[0][-1]) == B - 1 and int(idx[1][-1]) == H // 4 - 1 \
        and int(idx[2][-1]) == W // 4 - 1

    print("KERNEL_OK")
</pallas_src>

<mosaic_0001>
module attributes {stable_mosaic.version = 11 : i64} {
  func.func @_patch_kernel(%arg0: i32, %arg1: i32, %arg2: memref<1x4x18x18xf32, #tpu.memory_space<vmem>>, %arg3: memref<1x1x4x4x6x6xf32, #tpu.memory_space<vmem>>) attributes {dimension_semantics = [#tpu.dimension_semantics<parallel>, #tpu.dimension_semantics<parallel>], iteration_bounds = array<i64: 2, 4>, scalar_prefetch = 0 : i64, scratch_operands = 0 : i64, tpu.core_type = #tpu.core_type<tc>, window_params = [{transform_indices = @transform_0, window_bounds = array<i64: 1, 4, 18, 18>}, {transform_indices = @transform_1, window_bounds = array<i64: 1, 1, 4, 4, 6, 6>}]} {
    %c4_i32 = arith.constant 4 : i32
    %0 = arith.muli %arg1, %c4_i32 : i32
    %1 = tpu.assume_multiple %0, 4 : i32
    %c0 = arith.constant 0 : index
    %c0_0 = arith.constant 0 : index
    %2 = arith.index_cast %1 : i32 to index
    %c0_1 = arith.constant 0 : index
    %3 = vector.load %arg2[%c0, %c0_0, %2, %c0_1] : memref<1x4x18x18xf32, #tpu.memory_space<vmem>>, vector<1x4x6x18xf32>
    %4 = vector.shape_cast %3 : vector<1x4x6x18xf32> to vector<4x6x18xf32>
    %5 = vector.extract_strided_slice %4 {offsets = [0, 0, 0], sizes = [4, 6, 6], strides = [1, 1, 1]} : vector<4x6x18xf32> to vector<4x6x6xf32>
    %6 = vector.extract_strided_slice %4 {offsets = [0, 0, 4], sizes = [4, 6, 6], strides = [1, 1, 1]} : vector<4x6x18xf32> to vector<4x6x6xf32>
    %7 = vector.extract_strided_slice %4 {offsets = [0, 0, 8], sizes = [4, 6, 6], strides = [1, 1, 1]} : vector<4x6x18xf32> to vector<4x6x6xf32>
    %8 = vector.extract_strided_slice %4 {offsets = [0, 0, 12], sizes = [4, 6, 6], strides = [1, 1, 1]} : vector<4x6x18xf32> to vector<4x6x6xf32>
    %9 = vector.shape_cast %5 : vector<4x6x6xf32> to vector<1x4x6x6xf32>
    %10 = vector.shape_cast %6 : vector<4x6x6xf32> to vector<1x4x6x6xf32>
    %11 = vector.shape_cast %7 : vector<4x6x6xf32> to vector<1x4x6x6xf32>
    %12 = vector.shape_cast %8 : vector<4x6x6xf32> to vector<1x4x6x6xf32>
    %13 = tpu.concatenate %9, %10, %11, %12 in 0 : vector<1x4x6x6xf32>, vector<1x4x6x6xf32>, vector<1x4x6x6xf32>, vector<1x4x6x6xf32> -> vector<4x4x6x6xf32>
    %c0_2 = arith.constant 0 : index
    %c0_3 = arith.constant 0 : index
    %c0_4 = arith.constant 0 : index
    %c0_5 = arith.constant 0 : index
    %c0_6 = arith.constant 0 : index
    %c0_7 = arith.constant 0 : index
    %14 = vector.load %arg3[%c0_2, %c0_3, %c0_4, %c0_5, %c0_6, %c0_7] : memref<1x1x4x4x6x6xf32, #tpu.memory_space<vmem>>, vector<1x1x4x4x6x6xf32>
    %15 = vector.shape_cast %14 : vector<1x1x4x4x6x6xf32> to vector<4x4x6x6xf32>
    %16 = vector.shape_cast %13 : vector<4x4x6x6xf32> to vector<1x1x4x4x6x6xf32>
    tpu.vector_store %arg3[%c0_2, %c0_3, %c0_4, %c0_5, %c0_6, %c0_7], %16 {strides = array<i32>} : memref<1x1x4x4x6x6xf32, #tpu.memory_space<vmem>>, vector<1x1x4x4x6x6xf32>,
    return
  }
  func.func @transform_0(%arg0: i32, %arg1: i32) -> (i32, i32, i32, i32) {
    %c0_i32 = arith.constant 0 : i32
    %c0_i32_0 = arith.constant 0 : i32
    %c0_i32_1 = arith.constant 0 : i32
    %c0_i32_2 = arith.constant 0 : i32
    return %arg0, %c0_i32, %c0_i32_0, %c0_i32_1 : i32, i32, i32, i32
  }
  func.func @transform_1(%arg0: i32, %arg1: i32) -> (i32, i32, i32, i32, i32, i32) {
    %c0_i32 = arith.constant 0 : i32
    %c0_i32_0 = arith.constant 0 : i32
    %c0_i32_1 = arith.constant 0 : i32
    %c0_i32_2 = arith.constant 0 : i32
    %c0_i32_3 = arith.constant 0 : i32
    return %arg0, %arg1, %c0_i32, %c0_i32_0, %c0_i32_1, %c0_i32_2 : i32, i32, i32, i32, i32, i32
  }
}

</mosaic_0001>

<bundles_post_ra>
// kernel: generate_mask_all_patches.1
= control target key start
LH: loop header
LB: loop body
LE: loop exit
PB: predicated region body
PF: predicated region fallthrough
CT: control target
= control target key end

     0   :  { %s399_s6 = smov 0   ;;  %s401_s7 = smov 0   ;;  %s484_s0 = inlined_call_operand.vmem [shape: f32[2,4,18,18], index: 0, kind: input, shape index: {}]   ;;  %s485_s1 = inlined_call_operand.vmem [shape: f32[2,4,4,4,6,6], index: 1, kind: output, shape index: {}]  }
   0x1   :  { %s403_s8 = smov 0   ;;  %s405_s9 = smov 0  }
   0x2   :  { %s407_s10 = smov 0  }
   0x3 LB: > { %s20_s11 = sadd.s32 1, %s376_s8  ;;  %s23_s12 = sadd.s32 1, %s380_s9  ;;  %s384_s10 = sphi %s407_s10, %s11_s10   ;;  %s380_s9 = sphi %s405_s9, %s489_s9   ;;  %s376_s8 = sphi %s403_s8, %s488_s8   ;;  %s372_s7 = sphi %s401_s7, %s487_s7   ;;  %s368_s6 = sphi %s399_s6, %s486_s6  }
   0x4   : > { %p21_p0 = scmp.ge.s32.totalorder %s20_s11, 4  ;;  %p294_p1 = scmp.ge.s32.totalorder %s384_s10, 1 }
   0x5   : > { %p101_p2 = scmp.lt.s32.totalorder %s384_s10, 9 }
   0x6   : > { %s491_s11 = smov (%p21_p0, %s20_s11), 0  ;;  %s493_s12 = smov (!%p21_p0, %s23_s12), %s380_s9 }
   0x7   : > { %p102_p3 = pnand %p294_p1, %p101_p2  ;;  %p25_p4 = scmp.ge.s32.totalorder %s493_s12, 2 }
   0x8   : > { %p125_p5 = scmp.lt.s32.totalorder (!%p102_p3), %s372_s7, 1  ;;  %p132_p6 = scmp.lt.s32.totalorder (!%p102_p3), %s368_s6, 3  ;;  %vm185_vm0 = vcmask (!%p102_p3), 46080  }
   0x9   : > { %s495_s12 = smov (%p25_p4, %s493_s12), 0  ;;  %105 = sbr.rel (%p102_p3) target bundleno = 158 (0x9e), region = 24 }
   0xa   : > { %s299_s13 = sshll.u32 (!%p102_p3), %s368_s6, 2  ;;  %s386_s26 = smov (!%p102_p3), 124  }
   0xb   : > { %s387_s27 = smov (!%p102_p3), 120   ;;  %s388_s28 = smov (!%p102_p3), 116  }
  0x10   : > { %s497_s7 = smov (!%p125_p5, %s372_s7), 1  ;;  %s499_s6 = smov (!%p132_p6, %s368_s6), 3 }
  0x11   : > { %s302_s14 = smul.u32 96, %s497_s7  ;;  %s297_s15 = sshll.u32 %s497_s7, 6 }
  0x12   : > { %s296_s16 = sshll.u32 %s499_s6, 4 }
  0x13   : > { %s129_s19 = scalar_lea.vmem %s484_s0, %s302_s14  ;;  %s136_s20 = sadd.s32 %s297_s15, %s296_s16 }
  0x14   : > { %s298_s21 = sshll.u32 %s136_s20, 3  ;;  %s140_s22 = scalar_lea.vmem %s129_s19, %s299_s13 }
  0x15   : > { %s435_s25 = scalar_lea.vmem %s485_s1, %s298_s21  ;;  %v143_v0 = vld [vmem:[%s140_s22 + $0x30] sm:$0x3f]  ;;  %v141_v1 = vld [vmem:[%s140_s22] sm:$0x3f]  ;;  %v144_v2 = vld [vmem:[%s140_s22 + $0x48] sm:$0x3f] }
  0x16   : > { %153 = vrot.lane.b32.xlu1 %v143_v0, %s386_s26  ;;  %188 = vst.msk [vmem:[%s435_s25 + $0x10] sm:$0x3f] %vm185_vm0, %v143_v0  ;;  %149 = vrot.lane.b32.xlu0 %v141_v1, %s386_s26  ;;  %186 = vst.msk [vmem:[%s435_s25] sm:$0x3f] %vm185_vm0, %v141_v1 }
  0x17   : > { %189 = vst.msk [vmem:[%s435_s25 + $0x18] sm:$0x3f] %vm185_vm0, %v144_v2  ;;  %v142_v3 = vld [vmem:[%s140_s22 + $0x18] sm:$0x3f] }
  0x18   : > { %187 = vst.msk [vmem:[%s435_s25 + $0x8] sm:$0x3f] %vm185_vm0, %v142_v3 }
  0x1a   : > { %155 = vrot.lane.b32.xlu1 %v144_v2, %s386_s26  ;;  %151 = vrot.lane.b32.xlu0 %v142_v3, %s386_s26 }
  0x1e   : > { %163 = vrot.lane.b32.xlu1 %v142_v3, %s387_s27  ;;  %161 = vrot.lane.b32.xlu0 %v141_v1, %s387_s27 }
  0x22   : > { %167 = vrot.lane.b32.xlu1 %v144_v2, %s387_s27  ;;  %165 = vrot.lane.b32.xlu0 %v143_v0, %s387_s27 }
  0x26   : > { %175 = vrot.lane.b32.xlu1 %v142_v3, %s388_s28  ;;  %173 = vrot.lane.b32.xlu0 %v141_v1, %s388_s28 }
  0x2a   : > { %179 = vrot.lane.b32.xlu1 %v144_v2, %s388_s28  ;;  %177 = vrot.lane.b32.xlu0 %v143_v0, %s388_s28 }
  0x88   : > { %v154_v4 = vpop.permute.xlu1 %153  ;;  %v150_v5 = vpop.permute.xlu0 %149 }
  0x89   : > { %192 = vst.msk [vmem:[%s435_s25 + $0x30] sm:$0x3f] %vm185_vm0, %v154_v4  ;;  %190 = vst.msk [vmem:[%s435_s25 + $0x20] sm:$0x3f] %vm185_vm0, %v150_v5 }
  0x8c   : > { %v156_v6 = vpop.permute.xlu1 %155  ;;  %v152_v7 = vpop.permute.xlu0 %151 }
  0x8d   : > { %193 = vst.msk [vmem:[%s435_s25 + $0x38] sm:$0x3f] %vm185_vm0, %v156_v6  ;;  %191 = vst.msk [vmem:[%s435_s25 + $0x28] sm:$0x3f] %vm185_vm0, %v152_v7 }
  0x90   : > { %v164_v8 = vpop.permute.xlu1 %163  ;;  %v162_v9 = vpop.permute.xlu0 %161 }
  0x91   : > { %195 = vst.msk [vmem:[%s435_s25 + $0x48] sm:$0x3f] %vm185_vm0, %v164_v8  ;;  %194 = vst.msk [vmem:[%s435_s25 + $0x40] sm:$0x3f] %vm185_vm0, %v162_v9 }
  0x94   : > { %v168_v10 = vpop.permute.xlu1 %167  ;;  %v166_v11 = vpop.permute.xlu0 %165 }
  0x95   : > { %197 = vst.msk [vmem:[%s435_s25 + $0x58] sm:$0x3f] %vm185_vm0, %v168_v10  ;;  %196 = vst.msk [vmem:[%s435_s25 + $0x50] sm:$0x3f] %vm185_vm0, %v166_v11 }
  0x98   : > { %v176_v12 = vpop.permute.xlu1 %175  ;;  %v174_v13 = vpop.permute.xlu0 %173 }
  0x99   : > { %199 = vst.msk [vmem:[%s435_s25 + $0x68] sm:$0x3f] %vm185_vm0, %v176_v12  ;;  %198 = vst.msk [vmem:[%s435_s25 + $0x60] sm:$0x3f] %vm185_vm0, %v174_v13 }
  0x9c   : > { %v180_v14 = vpop.permute.xlu1 %179  ;;  %v178_v15 = vpop.permute.xlu0 %177 }
  0x9d   : > { %201 = vst.msk [vmem:[%s435_s25 + $0x78] sm:$0x3f] %vm185_vm0, %v180_v14  ;;  %200 = vst.msk [vmem:[%s435_s25 + $0x70] sm:$0x3f] %vm185_vm0, %v178_v15 }
  0x9e PF: > { %s11_s10 = sadd.s32 1, %s384_s10   ;;  %s486_s6 = smov %s376_s8 }
  0x9f   : > { %p8_p7 = scmp.ge.s32.totalorder %s11_s10, 10   ;;  %s487_s7 = smov %s380_s9 }
  0xa0   : > { %s488_s8 = smov %s491_s11  ;;  %s489_s9 = smov %s495_s12 }
  0xa1   :  { %10 = sbr.rel (!%p8_p7) target bundleno = 3 (0x3), region = 55 }

</bundles_post_ra>
